<compile_context>
chip_gen: v7x
topology: tpu7x:2x2x1
jax: 0.10.0
libtpu: 0.0.40
codegen_flags: <defaults>
</compile_context>

<pallas_src>
import jax
import jax.numpy as jnp
from jax import lax
from jax.experimental import pallas as pl
from jax.experimental.pallas import tpu as pltpu

LANE = 128
SUBLANE = 8


def _round_up(x, m):
    return (x + m - 1) // m * m


def _fc_fused_kernel(x_ref, w1_ref, b1_ref, w2_ref, b2_ref, o_ref):
    # Layer 1: (TB, Fp) @ (Fp, Hp) on the MXU, f32 accumulate, + bias.
    z2 = jnp.dot(x_ref[...], w1_ref[...],
                 preferred_element_type=jnp.float32) + b1_ref[...]
    # Sigmoid (exp on the EUP).  Matches FC.sigmoid = 1 / (1 + exp(-z)).
    a2 = 1.0 / (1.0 + jnp.exp(-z2))
    # Layer 2: (TB, Hp) @ (Hp, Np) with lane-dense Np (multiple of 128).
    z3 = jnp.dot(a2.astype(w2_ref.dtype), w2_ref[...],
                 preferred_element_type=jnp.float32) + b2_ref[...]
    o_ref[...] = z3


def _fused_mlp(x2, w1, b1, w2, b2):
    """x2: (B, F) f32.  w1: (H, F), b1: (H,), w2: (N, H), b2: (N,) (PyTorch layout)."""
    B, F = x2.shape
    H = w1.shape[0]
    N = w2.shape[0]

    Fp = _round_up(F, LANE)          # 561 -> 640
    Hp = _round_up(H, LANE)          # 256 -> 256
    Np = _round_up(N, LANE)          # 5   -> 128
    Bp = _round_up(max(B, 1), SUBLANE)
    TB = Bp if Bp <= 128 else 128
    Bp = _round_up(Bp, TB)

    # Zero-pad + cast to bf16 for the MXU.  Zero pad rows/cols keep the math
    # exact (padded W1 rows / W2 rows are zero, so padded-lane garbage such as
    # sigmoid(0)=0.5 never reaches a real output column).
    xb = jnp.zeros((Bp, Fp), jnp.bfloat16).at[:B, :F].set(
        x2.astype(jnp.bfloat16))
    w1b = jnp.zeros((Fp, Hp), jnp.bfloat16).at[:F, :H].set(
        w1.T.astype(jnp.bfloat16))
    b1p = jnp.zeros((1, Hp), jnp.float32).at[0, :H].set(
        b1.astype(jnp.float32))
    w2b = jnp.zeros((Hp, Np), jnp.bfloat16).at[:H, :N].set(
        w2.T.astype(jnp.bfloat16))
    b2p = jnp.zeros((1, Np), jnp.float32).at[0, :N].set(
        b2.astype(jnp.float32))

    out = pl.pallas_call(
        _fc_fused_kernel,
        out_shape=jax.ShapeDtypeStruct((Bp, Np), jnp.float32),
        grid_spec=pltpu.PrefetchScalarGridSpec(
            num_scalar_prefetch=0,
            grid=(Bp // TB,),
            in_specs=[
                pl.BlockSpec((TB, Fp), lambda i: (i, 0)),   # activations (tiled)
                pl.BlockSpec((Fp, Hp), lambda i: (0, 0)),   # W1 (resident)
                pl.BlockSpec((1, Hp), lambda i: (0, 0)),    # b1
                pl.BlockSpec((Hp, Np), lambda i: (0, 0)),   # W2 (resident)
                pl.BlockSpec((1, Np), lambda i: (0, 0)),    # b2
            ],
            out_specs=pl.BlockSpec((TB, Np), lambda i: (i, 0)),
        ),
        compiler_params=pltpu.CompilerParams(
            dimension_semantics=("parallel",)),
    )(xb, w1b, b1p, w2b, b2p)

    return out[:B, :N]


def fc_forward(x, params):
    """Forward pass of FC.  x: 2D/3D passes through, >3D is flattened per-batch."""
    if x.ndim > 3:
        out_lead = (x.shape[0],)
        x2 = x.reshape(x.shape[0], -1)
    else:
        out_lead = x.shape[:-1]
        x2 = x.reshape(-1, x.shape[-1])
    x2 = x2.astype(jnp.float32)
    out = _fused_mlp(x2, params["w1"], params["b1"],
                     params["w2"], params["b2"])
    return out.reshape(*out_lead, params["w2"].shape[0])
    # TODO(synk): FC.loss is a training-time helper, not part of forward; not implemented.


def reference_forward(x, params):
    """Pure-JAX (XLA, f32 HIGHEST) reference with PyTorch semantics."""
    if x.ndim > 3:
        x2 = x.reshape(x.shape[0], -1)
    else:
        x2 = x
    z2 = jnp.dot(x2, params["w1"].T,
                 precision=lax.Precision.HIGHEST) + params["b1"]
    a2 = 1.0 / (1.0 + jnp.exp(-z2))
    return jnp.dot(a2, params["w2"].T,
                   precision=lax.Precision.HIGHEST) + params["b2"]


if __name__ == "__main__":
    inputNode, hiddenNode, outputNode = 561, 256, 5
    key = jax.random.PRNGKey(0)
    kx, k1, k2, k3, k4 = jax.random.split(key, 5)
    params = {
        "w1": 0.05 * jax.random.normal(k1, (hiddenNode, inputNode), jnp.float32),
        "b1": 0.05 * jax.random.normal(k2, (hiddenNode,), jnp.float32),
        "w2": 0.05 * jax.random.normal(k3, (outputNode, hiddenNode), jnp.float32),
        "b2": 0.05 * jax.random.normal(k4, (outputNode,), jnp.float32),
    }
    # 4D input (batch, 3, 11, 17): 3*11*17 == 561 == inputNode, which exercises
    # the `X.view(X.size(0), -1)` flatten branch of FC.forward.
    x = jax.random.normal(kx, (2, 3, 11, 17), jnp.float32)

    out = jax.jit(fc_forward)(x, params)
    out = jax.block_until_ready(out)
    assert out.shape == (2, outputNode), out.shape

    ref = reference_forward(x, params)
    err = float(jnp.max(jnp.abs(out - ref)))
    if err > 5e-2:
        raise AssertionError(f"mismatch vs reference: max abs err = {err}")
    print("KERNEL_OK")
</pallas_src>

<mosaic_0001>
module attributes {stable_mosaic.version = 11 : i64} {
  func.func @_fc_fused_kernel(%arg0: i32, %arg1: memref<8x640xbf16, #tpu.memory_space<vmem>>, %arg2: memref<640x256xbf16, #tpu.memory_space<vmem>>, %arg3: memref<1x256xf32, #tpu.memory_space<vmem>>, %arg4: memref<256x128xbf16, #tpu.memory_space<vmem>>, %arg5: memref<1x128xf32, #tpu.memory_space<vmem>>, %arg6: memref<8x128xf32, #tpu.memory_space<vmem>>) attributes {dimension_semantics = [#tpu.dimension_semantics<parallel>], iteration_bounds = array<i64: 1>, scalar_prefetch = 0 : i64, scratch_operands = 0 : i64, tpu.core_type = #tpu.core_type<tc>, window_params = [{transform_indices = @transform_0, window_bounds = array<i64: 8, 640>}, {pipeline_mode = #tpu.pipeline_mode<synchronous>, transform_indices = @transform_1, window_bounds = array<i64: 640, 256>}, {pipeline_mode = #tpu.pipeline_mode<synchronous>, transform_indices = @transform_2, window_bounds = array<i64: 1, 256>}, {pipeline_mode = #tpu.pipeline_mode<synchronous>, transform_indices = @transform_3, window_bounds = array<i64: 256, 128>}, {pipeline_mode = #tpu.pipeline_mode<synchronous>, transform_indices = @transform_4, window_bounds = array<i64: 1, 128>}, {transform_indices = @transform_5, window_bounds = array<i64: 8, 128>}]} {
    %c0 = arith.constant 0 : index
    %c0_0 = arith.constant 0 : index
    %0 = vector.load %arg1[%c0, %c0_0] : memref<8x640xbf16, #tpu.memory_space<vmem>>, vector<8x640xbf16>
    %c0_1 = arith.constant 0 : index
    %c0_2 = arith.constant 0 : index
    %1 = vector.load %arg2[%c0_1, %c0_2] : memref<640x256xbf16, #tpu.memory_space<vmem>>, vector<640x256xbf16>
    %cst = arith.constant dense<0.000000e+00> : vector<8x256xf32>
    %2 = tpu.matmul %0, %1, %cst {dimension_numbers = #tpu.dot_dimension_numbers<[1], [0], [0], [1], [0, 0, 1, 1], [], []>} : vector<8x640xbf16>, vector<640x256xbf16>, vector<8x256xf32> -> vector<8x256xf32>
    %c0_3 = arith.constant 0 : index
    %c0_4 = arith.constant 0 : index
    %3 = vector.load %arg3[%c0_3, %c0_4] : memref<1x256xf32, #tpu.memory_space<vmem>>, vector<1x256xf32>
    %4 = vector.broadcast %3 : vector<1x256xf32> to vector<8x256xf32>
    %5 = arith.addf %2, %4 : vector<8x256xf32>
    %cst_5 = arith.constant 0.000000e+00 : f32
    %6 = vector.broadcast %cst_5 : f32 to vector<8x256xf32>
    %7 = arith.subf %6, %5 : vector<8x256xf32>
    %8 = math.exp %7 : vector<8x256xf32>
    %cst_6 = arith.constant 1.000000e+00 : f32
    %9 = vector.broadcast %cst_6 : f32 to vector<8x256xf32>
    %10 = arith.addf %9, %8 : vector<8x256xf32>
    %cst_7 = arith.constant 1.000000e+00 : f32
    %11 = vector.broadcast %cst_7 : f32 to vector<8x256xf32>
    %12 = arith.divf %11, %10 : vector<8x256xf32>
    %13 = arith.truncf %12 : vector<8x256xf32> to vector<8x256xbf16>
    %c0_8 = arith.constant 0 : index
    %c0_9 = arith.constant 0 : index
    %14 = vector.load %arg4[%c0_8, %c0_9] : memref<256x128xbf16, #tpu.memory_space<vmem>>, vector<256x128xbf16>
    %cst_10 = arith.constant dense<0.000000e+00> : vector<8x128xf32>
    %15 = tpu.matmul %13, %14, %cst_10 {dimension_numbers = #tpu.dot_dimension_numbers<[1], [0], [0], [1], [0, 0, 1, 1], [], []>} : vector<8x256xbf16>, vector<256x128xbf16>, vector<8x128xf32> -> vector<8x128xf32>
    %c0_11 = arith.constant 0 : index
    %c0_12 = arith.constant 0 : index
    %16 = vector.load %arg5[%c0_11, %c0_12] : memref<1x128xf32, #tpu.memory_space<vmem>>, vector<1x128xf32>
    %17 = vector.broadcast %16 : vector<1x128xf32> to vector<8x128xf32>
    %18 = arith.addf %15, %17 : vector<8x128xf32>
    %c0_13 = arith.constant 0 : index
    %c0_14 = arith.constant 0 : index
    %19 = vector.load %arg6[%c0_13, %c0_14] : memref<8x128xf32, #tpu.memory_space<vmem>>, vector<8x128xf32>
    tpu.vector_store %arg6[%c0_13, %c0_14], %18 {strides = array<i32>} : memref<8x128xf32, #tpu.memory_space<vmem>>, vector<8x128xf32>,
    return
  }
  func.func @transform_0(%arg0: i32) -> (i32, i32) {
    %c0_i32 = arith.constant 0 : i32
    %c0_i32_0 = arith.constant 0 : i32
    return %arg0, %c0_i32 : i32, i32
  }
  func.func @transform_1(%arg0: i32) -> (i32, i32) {
    %c0_i32 = arith.constant 0 : i32
    %c0_i32_0 = arith.constant 0 : i32
    %c0_i32_1 = arith.constant 0 : i32
    return %c0_i32, %c0_i32_0 : i32, i32
  }
  func.func @transform_2(%arg0: i32) -> (i32, i32) {
    %c0_i32 = arith.constant 0 : i32
    %c0_i32_0 = arith.constant 0 : i32
    %c0_i32_1 = arith.constant 0 : i32
    return %c0_i32, %c0_i32_0 : i32, i32
  }
  func.func @transform_3(%arg0: i32) -> (i32, i32) {
    %c0_i32 = arith.constant 0 : i32
    %c0_i32_0 = arith.constant 0 : i32
    %c0_i32_1 = arith.constant 0 : i32
    return %c0_i32, %c0_i32_0 : i32, i32
  }
  func.func @transform_4(%arg0: i32) -> (i32, i32) {
    %c0_i32 = arith.constant 0 : i32
    %c0_i32_0 = arith.constant 0 : i32
    %c0_i32_1 = arith.constant 0 : i32
    return %c0_i32, %c0_i32_0 : i32, i32
  }
  func.func @transform_5(%arg0: i32) -> (i32, i32) {
    %c0_i32 = arith.constant 0 : i32
    %c0_i32_0 = arith.constant 0 : i32
    return %arg0, %c0_i32 : i32, i32
  }
}

</mosaic_0001>

<bundles_post_ra>
// kernel: fc_forward.1
= control target key start
LH: loop header
LB: loop body
LE: loop exit
PB: predicated region body
PF: predicated region fallthrough
CT: control target
= control target key end

     0   :  { %s1476_s1 = inlined_call_operand.vmem [shape: bf16[640,256], index: 1, kind: input, shape index: {}]   ;;  %s1477_s0 = inlined_call_operand.vmem [shape: bf16[8,640], index: 0, kind: input, shape index: {}]   ;;  %s1478_s3 = inlined_call_operand.vmem [shape: bf16[256,128], index: 3, kind: input, shape index: {}]   ;;  %s1479_s2 = inlined_call_operand.vmem [shape: f32[1,256], index: 2, kind: input, shape index: {}]   ;;  %s1480_s4 = inlined_call_operand.vmem [shape: f32[1,128], index: 4, kind: input, shape index: {}]   ;;  %s1481_s5 = inlined_call_operand.vmem [shape: f32[8,128], index: 5, kind: output, shape index: {}]  }
   0x1   :  { %v984_v0 = vld [vmem:[%s1476_s1 + $0x104] ss:$8 sps:$4 sm:$0xff]   ;;  %v986_v1 = vld [vmem:[%s1476_s1 + $0x100] ss:$8 sps:$4 sm:$0xff]   ;;  %v987_v2 = vld [vmem:[%s1476_s1 + $0x114] ss:$8 sps:$4 sm:$0xff]  }
   0x2   :  { %575 = vmatprep.subr.bf16.mxu0 %v984_v0  ;;  %v989_v3 = vld [vmem:[%s1476_s1 + $0x110] ss:$8 sps:$4 sm:$0xff]   ;;  %v990_v4 = vld [vmem:[%s1476_s1 + $0x124] ss:$8 sps:$4 sm:$0xff]   ;;  %v992_v5 = vld [vmem:[%s1476_s1 + $0x120] ss:$8 sps:$4 sm:$0xff]  }
   0x3   :  { %576 = vmatpush1.bf16.msra.mxu0 %v986_v1  ;;  %v993_v6 = vld [vmem:[%s1476_s1 + $0x134] ss:$8 sps:$4 sm:$0xff]   ;;  %v1005_v7 = vld [vmem:[%s1476_s1 + $0x4] ss:$8 sps:$4 sm:$0xff]   ;;  %v1007_v8 = vld [vmem:[%s1476_s1] ss:$8 sps:$4 sm:$0xff]  }
   0x4   :  { %577 = vmatprep.subr.bf16.mxu0 %v987_v2  ;;  %v995_v9 = vld [vmem:[%s1476_s1 + $0x130] ss:$8 sps:$4 sm:$0xff]   ;;  %v996_v10 = vld [vmem:[%s1476_s1 + $0x144] ss:$8 sps:$4 sm:$0xff]   ;;  %534 = vmatprep.subr.bf16.mxu1 %v1005_v7  ;;  %v1011_v11 = vld [vmem:[%s1476_s1 + $0x14] ss:$8 sps:$4 sm:$0xff]  }
   0x5   :  { %535 = vmatpush1.bf16.msra.mxu1 %v1007_v8  ;;  %v1013_v12 = vld [vmem:[%s1476_s1 + $0x10] ss:$8 sps:$4 sm:$0xff]   ;;  %v998_v13 = vld [vmem:[%s1476_s1 + $0x140] ss:$8 sps:$4 sm:$0xff]   ;;  %v1017_v14 = vld [vmem:[%s1476_s1 + $0x24] ss:$8 sps:$4 sm:$0xff]  }
   0x6   :  { %536 = vmatprep.subr.bf16.mxu1 %v1011_v11  ;;  %v999_v15 = vld [vmem:[%s1476_s1 + $0x154] ss:$8 sps:$4 sm:$0xff]   ;;  %v1019_v16 = vld [vmem:[%s1476_s1 + $0x20] ss:$8 sps:$4 sm:$0xff]   ;;  %v1001_v18 = vld [vmem:[%s1476_s1 + $0x150] ss:$8 sps:$4 sm:$0xff]  }
   0x7   :  { %578 = vmatpush1.bf16.msra.mxu0 %v989_v3  ;;  %v1023_v17 = vld [vmem:[%s1476_s1 + $0x34] ss:$8 sps:$4 sm:$0xff]   ;;  %v1002_v19 = vld [vmem:[%s1476_s1 + $0x164] ss:$8 sps:$4 sm:$0xff]   ;;  %v1025_v20 = vld [vmem:[%s1476_s1 + $0x30] ss:$8 sps:$4 sm:$0xff]  }
   0x8   :  { %579 = vmatprep.subr.bf16.mxu0 %v990_v4  ;;  %v1029_v21 = vld [vmem:[%s1476_s1 + $0x44] ss:$8 sps:$4 sm:$0xff]   ;;  %v1004_v22 = vld [vmem:[%s1476_s1 + $0x160] ss:$8 sps:$4 sm:$0xff]   ;;  %v1008_v23 = vld [vmem:[%s1476_s1 + $0x174] ss:$8 sps:$4 sm:$0xff]  }
   0x9   :  { %537 = vmatpush1.bf16.msra.mxu1 %v1013_v12  ;;  %v1031_v24 = vld [vmem:[%s1476_s1 + $0x40] ss:$8 sps:$4 sm:$0xff]   ;;  %v1035_v25 = vld [vmem:[%s1476_s1 + $0x54] ss:$8 sps:$4 sm:$0xff]   ;;  %v1010_v26 = vld [vmem:[%s1476_s1 + $0x170] ss:$8 sps:$4 sm:$0xff]  }
   0xa   :  { %538 = vmatprep.subr.bf16.mxu1 %v1017_v14  ;;  %v1014_v27 = vld [vmem:[%s1476_s1 + $0x184] ss:$8 sps:$4 sm:$0xff]   ;;  %v1037_v28 = vld [vmem:[%s1476_s1 + $0x50] ss:$8 sps:$4 sm:$0xff]   ;;  %v1016_v30 = vld [vmem:[%s1476_s1 + $0x180] ss:$8 sps:$4 sm:$0xff]  }
   0xb   :  { %580 = vmatpush1.bf16.msra.mxu0 %v992_v5  ;;  %v1041_v29 = vld [vmem:[%s1476_s1 + $0x64] ss:$8 sps:$4 sm:$0xff]   ;;  %v1020_v31 = vld [vmem:[%s1476_s1 + $0x194] ss:$8 sps:$4 sm:$0xff]   ;;  %v1043_v32 = vld [vmem:[%s1476_s1 + $0x60] ss:$8 sps:$4 sm:$0xff]  }
   0xc   :  { %581 = vmatprep.subr.bf16.mxu0 %v993_v6  ;;  %v1047_v33 = vld [vmem:[%s1476_s1 + $0x74] ss:$8 sps:$4 sm:$0xff]   ;;  %v1269_v34 = vld [vmem:[%s1477_s0 + $0x8] sm:$0xff]  ;;  %v1022_v35 = vld [vmem:[%s1476_s1 + $0x190] ss:$8 sps:$4 sm:$0xff]   ;;  %v1133_v8 = vmov 0  }
   0xd   :  { %539 = vmatpush1.bf16.msra.mxu1 %v1019_v16  ;;  %v854_v36 = vcombine.high %v1269_v34, %v1269_v34  ;;  %v1026_v37 = vld [vmem:[%s1476_s1 + $0x1a4] ss:$8 sps:$4 sm:$0xff]   ;;  %v1049_v38 = vld [vmem:[%s1476_s1 + $0x70] ss:$8 sps:$4 sm:$0xff]   ;;  %v1028_v40 = vld [vmem:[%s1476_s1 + $0x1a0] ss:$8 sps:$4 sm:$0xff]   ;;  %v853_v1 = vcombine.low %v1269_v34, %v1269_v34 }
   0xe   :  { %540 = vmatprep.subr.bf16.mxu1 %v1023_v17  ;;  %v1053_v39 = vld [vmem:[%s1476_s1 + $0x84] ss:$8 sps:$4 sm:$0xff]   ;;  %v1032_v41 = vld [vmem:[%s1476_s1 + $0x1b4] ss:$8 sps:$4 sm:$0xff]   ;;  %v1055_v42 = vld [vmem:[%s1476_s1 + $0x80] ss:$8 sps:$4 sm:$0xff]  }
   0xf   :  { %582 = vmatpush1.bf16.msra.mxu0 %v995_v9  ;;  %607 = vmatprep.mubr.bf16.mxu0 %v854_v36  ;;  %v1059_v43 = vld [vmem:[%s1476_s1 + $0x94] ss:$8 sps:$4 sm:$0xff]   ;;  %v1034_v44 = vld [vmem:[%s1476_s1 + $0x1b0] ss:$8 sps:$4 sm:$0xff]   ;;  %v1038_v45 = vld [vmem:[%s1476_s1 + $0x1c4] ss:$8 sps:$4 sm:$0xff]  }
  0x10   :  { %583 = vmatprep.subr.bf16.mxu0 %v996_v10  ;;  %v1061_v46 = vld [vmem:[%s1476_s1 + $0x90] ss:$8 sps:$4 sm:$0xff]   ;;  %v1068_v47 = vld [vmem:[%s1476_s1 + $0xa4] ss:$8 sps:$4 sm:$0xff]   ;;  %v1040_v48 = vld [vmem:[%s1476_s1 + $0x1c0] ss:$8 sps:$4 sm:$0xff]  }
  0x11   :  { %541 = vmatpush1.bf16.msra.mxu1 %v1025_v20  ;;  %v1044_v49 = vld [vmem:[%s1476_s1 + $0x1d4] ss:$8 sps:$4 sm:$0xff]   ;;  %v1070_v50 = vld [vmem:[%s1476_s1 + $0xa0] ss:$8 sps:$4 sm:$0xff]   ;;  %v1046_v52 = vld [vmem:[%s1476_s1 + $0x1d0] ss:$8 sps:$4 sm:$0xff]  }
  0x12   :  { %542 = vmatprep.subr.bf16.mxu1 %v1029_v21  ;;  %v1074_v51 = vld [vmem:[%s1476_s1 + $0xb4] ss:$8 sps:$4 sm:$0xff]   ;;  %v1050_v53 = vld [vmem:[%s1476_s1 + $0x1e4] ss:$8 sps:$4 sm:$0xff]   ;;  %v1076_v54 = vld [vmem:[%s1476_s1 + $0xb0] ss:$8 sps:$4 sm:$0xff]  }
  0x13   :  { %584 = vmatpush1.bf16.msra.mxu0 %v998_v13  ;;  %v21_v55 = vld [vmem:[%s1477_s0] sm:$0xff]  ;;  %v1056_v59 = vld [vmem:[%s1476_s1 + $0x1f4] ss:$8 sps:$4 sm:$0xff]   ;;  %v1058_v62 = vld [vmem:[%s1476_s1 + $0x1f0] ss:$8 sps:$4 sm:$0xff]  }
  0x14   :  { %585 = vmatprep.subr.bf16.mxu0 %v999_v15  ;;  %v1080_v56 = vld [vmem:[%s1476_s1 + $0xc4] ss:$8 sps:$4 sm:$0xff]   ;;  %v852_v57 = vcombine.high %v21_v55, %v21_v55  ;;  %v1052_v58 = vld [vmem:[%s1476_s1 + $0x1e0] ss:$8 sps:$4 sm:$0xff]   ;;  %v1086_v61 = vld [vmem:[%s1476_s1 + $0xd4] ss:$8 sps:$4 sm:$0xff]   ;;  %v851_v13 = vcombine.low %v21_v55, %v21_v55 }
  0x15   :  { %543 = vmatpush1.bf16.msra.mxu1 %v1031_v24  ;;  %v1082_v60 = vld [vmem:[%s1476_s1 + $0xc0] ss:$8 sps:$4 sm:$0xff]   ;;  %v1067_v63 = vld [vmem:[%s1476_s1 + $0x204] ss:$8 sps:$4 sm:$0xff]   ;;  %v1088_v0 = vld [vmem:[%s1476_s1 + $0xd0] ss:$8 sps:$4 sm:$0xff]  }
  0x16   :  { %544 = vmatprep.subr.bf16.mxu1 %v1035_v25  ;;  %566 = vmatprep.mubr.bf16.mxu1 %v852_v57  ;;  %v1092_v2 = vld [vmem:[%s1476_s1 + $0xe4] ss:$8 sps:$4 sm:$0xff]   ;;  %v1065_v3 = vld [vmem:[%s1476_s1 + $0x200] ss:$8 sps:$4 sm:$0xff]   ;;  %v1073_v4 = vld [vmem:[%s1476_s1 + $0x214] ss:$8 sps:$4 sm:$0xff]  }
  0x17   :  { %586 = vmatpush1.bf16.msra.mxu0 %v1001_v18  ;;  %v1094_v5 = vld [vmem:[%s1476_s1 + $0xe0] ss:$8 sps:$4 sm:$0xff]   ;;  %v1098_v6 = vld [vmem:[%s1476_s1 + $0xf4] ss:$8 sps:$4 sm:$0xff]   ;;  %v1071_v7 = vld [vmem:[%s1476_s1 + $0x210] ss:$8 sps:$4 sm:$0xff]  }
  0x18   :  { %587 = vmatprep.subr.bf16.mxu0 %v1002_v19  ;;  %v1079_v9 = vld [vmem:[%s1476_s1 + $0x224] ss:$8 sps:$4 sm:$0xff]   ;;  %v1100_v10 = vld [vmem:[%s1476_s1 + $0xf0] ss:$8 sps:$4 sm:$0xff]   ;;  %v1077_v11 = vld [vmem:[%s1476_s1 + $0x220] ss:$8 sps:$4 sm:$0xff]  }
  0x19   :  { %545 = vmatpush1.bf16.msra.mxu1 %v1037_v28  ;;  %v1085_v12 = vld [vmem:[%s1476_s1 + $0x234] ss:$8 sps:$4 sm:$0xff]   ;;  %v1083_v14 = vld [vmem:[%s1476_s1 + $0x230] ss:$8 sps:$4 sm:$0xff]   ;;  %v1091_v15 = vld [vmem:[%s1476_s1 + $0x244] ss:$8 sps:$4 sm:$0xff]  }
  0x1a   :  { %546 = vmatprep.subr.bf16.mxu1 %v1041_v29  ;;  %v1089_v16 = vld [vmem:[%s1476_s1 + $0x240] ss:$8 sps:$4 sm:$0xff]   ;;  %v1097_v17 = vld [vmem:[%s1476_s1 + $0x254] ss:$8 sps:$4 sm:$0xff]   ;;  %v1095_v18 = vld [vmem:[%s1476_s1 + $0x250] ss:$8 sps:$4 sm:$0xff]  }
  0x1b   :  { %588 = vmatpush1.bf16.msra.mxu0 %v1004_v22  ;;  %v1103_v19 = vld [vmem:[%s1476_s1 + $0x264] ss:$8 sps:$4 sm:$0xff]   ;;  %v1101_v20 = vld [vmem:[%s1476_s1 + $0x260] ss:$8 sps:$4 sm:$0xff]   ;;  %v1108_v21 = vld [vmem:[%s1476_s1 + $0x274] ss:$8 sps:$4 sm:$0xff]  }
  0x1c   :  { %589 = vmatprep.subr.bf16.mxu0 %v1008_v23  ;;  %v1106_v22 = vld [vmem:[%s1476_s1 + $0x270] ss:$8 sps:$4 sm:$0xff]   ;;  %v1109_v24 = vld [vmem:[%s1478_s3 + $0x40] sm:$0xff]   ;;  %v1119_v34 = vld [vmem:[%s1478_s3 + $0x68] sm:$0xff]  }
  0x1d   :  { %547 = vmatpush1.bf16.msra.mxu1 %v1043_v32  ;;  %v1064_v23 = vld [vmem:[%s1477_s0 + $0x10] ss:$0 sps:$4 sm:$0xff]   ;;  %v1110_v25 = vld [vmem:[%s1478_s3] sm:$0xff]  }
  0x1e   :  { %548 = vmatprep.subr.bf16.mxu1 %v1047_v33  ;;  %v1113_v28 = vld [vmem:[%s1478_s3 + $0x50] sm:$0xff]   ;;  %v1117_v32 = vld [vmem:[%s1478_s3 + $0x60] sm:$0xff]  }
  0x1f   :  { %590 = vmatpush1.bf16.msra.mxu0 %v1010_v26  ;;  %v1111_v26 = vld [vmem:[%s1478_s3 + $0x48] sm:$0xff]   ;;  %v1114_v29 = vld [vmem:[%s1478_s3 + $0x10] sm:$0xff]   ;;  %v1118_v33 = vld [vmem:[%s1478_s3 + $0x20] sm:$0xff]  }
  0x20   :  { %591 = vmatprep.subr.bf16.mxu0 %v1014_v27  ;;  %v1112_v27 = vld [vmem:[%s1478_s3 + $0x8] sm:$0xff]   ;;  %v1121_v36 = vld [vmem:[%s1478_s3 + $0x70] sm:$0xff]  }
  0x21   :  { %549 = vmatpush1.bf16.msra.mxu1 %v1049_v38  ;;  %v1123_v38 = vld [vmem:[%s1478_s3 + $0x78] sm:$0xff]  }
  0x22   :  { %550 = vmatprep.subr.bf16.mxu1 %v1053_v39  ;;  %v1124_v39 = vld [vmem:[%s1478_s3 + $0x38] sm:$0xff]  }
  0x23   :  { %592 = vmatpush1.bf16.msra.mxu0 %v1016_v30  ;;  %v1115_v30 = vld [vmem:[%s1478_s3 + $0x58] sm:$0xff]  }
  0x24   :  { %593 = vmatprep.subr.bf16.mxu0 %v1020_v31  ;;  %v1116_v31 = vld [vmem:[%s1478_s3 + $0x18] sm:$0xff]  }
  0x25   :  { %551 = vmatpush1.bf16.msra.mxu1 %v1055_v42 }
  0x26   :  { %552 = vmatprep.subr.bf16.mxu1 %v1059_v43  ;;  %v106_v43 = vlaneseq }
  0x27   :  { %594 = vmatpush1.bf16.msra.mxu0 %v1022_v35  ;;  %v1120_v35 = vld [vmem:[%s1478_s3 + $0x28] sm:$0xff]  }
  0x28   :  { %595 = vmatprep.subr.bf16.mxu0 %v1026_v37  ;;  %v1122_v37 = vld [vmem:[%s1478_s3 + $0x30] sm:$0xff]  }
  0x29   :  { %553 = vmatpush1.bf16.msra.mxu1 %v1061_v46 }
  0x2a   :  { %554 = vmatprep.subr.bf16.mxu1 %v1068_v47  ;;  %v104_v47 = vld [vmem:[%s1479_s2] sm:$0x3] }
  0x2b   :  { %596 = vmatpush1.bf16.msra.mxu0 %v1028_v40 }
  0x2c   :  { %597 = vmatprep.subr.bf16.mxu0 %v1032_v41 }
  0x2d   :  { %555 = vmatpush1.bf16.msra.mxu1 %v1070_v50 }
  0x2e   :  { %556 = vmatprep.subr.bf16.mxu1 %v1074_v51 }
  0x2f   :  { %598 = vmatpush1.bf16.msra.mxu0 %v1034_v44 }
  0x30   :  { %599 = vmatprep.subr.bf16.mxu0 %v1038_v45  ;;  %v107_v45 = vshrl.u32 %v106_v43, 7 }
  0x31   :  { %557 = vmatpush1.bf16.msra.mxu1 %v1076_v54 }
  0x32   :  { %558 = vmatprep.subr.bf16.mxu1 %v1080_v56  ;;  %v108_v46 = vsub.s32 0, %v107_v45 }
  0x33   :  { %600 = vmatpush1.bf16.msra.mxu0 %v1040_v48  ;;  %v112_v48 = vsub.s32 1, %v107_v45 }
  0x34   :  { %601 = vmatprep.subr.bf16.mxu0 %v1044_v49  ;;  %v109_v49 = vrot.slane %v104_v47, %v108_v46 }
  0x35   :  { %559 = vmatpush1.bf16.msra.mxu1 %v1082_v60  ;;  %v113_v50 = vrot.slane %v104_v47, %v112_v48 }
  0x36   :  { %560 = vmatprep.subr.bf16.mxu1 %v1086_v61 }
  0x37   :  { %602 = vmatpush1.bf16.msra.mxu0 %v1046_v52 }
  0x38   :  { %603 = vmatprep.subr.bf16.mxu0 %v1050_v53 }
  0x39   :  { %561 = vmatpush1.bf16.msra.mxu1 %v1088_v0 }
  0x3a   :  { %562 = vmatprep.subr.bf16.mxu1 %v1092_v2 }
  0x3b   :  { %604 = vmatpush1.bf16.msra.mxu0 %v1052_v58 }
  0x3c   :  { %605 = vmatprep.subr.bf16.mxu0 %v1056_v59 }
  0x3d   :  { %563 = vmatpush1.bf16.msra.mxu1 %v1094_v5 }
  0x3e   :  { %564 = vmatprep.subr.bf16.mxu1 %v1098_v6 }
  0x3f   :  { %606 = vmatpush1.bf16.msra.mxu0 %v1058_v62 }
  0x40   :  { %616 = vmatprep.subr.bf16.mxu0 %v1067_v63 }
  0x41   :  { %565 = vmatpush1.bf16.msra.mxu1 %v1100_v10 }
  0x42   :  { %608 = vmatmul.mubr.bf16.vlgmr.msra.gmra.mrb[0].mxu0 %v853_v1  ;;  %953 = vmatprep.subr.bf16.mxu1 %v1109_v24 }
  0x43   :  { %617 = vmatpush1.bf16.msra.mxu0 %v1065_v3  ;;  %648 = vmatprep.mubr.bf16.mxu0 %v1133_v8  ;;  %v936_v8 = vld [vmem:[%s1480_s4] ss:$0 sm:$0xff] }
  0x44   :  { %618 = vmatprep.subr.bf16.mxu0 %v1073_v4  ;;  %567 = vmatmul.mubr.bf16.vlgmr.msra.gmra.mrb[0].mxu1 %v851_v13 }
  0x45   :  { %954 = vmatpush3.bf16.msra.mxu1 %v1110_v25 }
  0x46   :  { %955 = vmatprep.subr.bf16.mxu1 %v1111_v26 }
  0x47   :  { %619 = vmatpush1.bf16.msra.mxu0 %v1071_v7 }
  0x48   :  { %620 = vmatprep.subr.bf16.mxu0 %v1079_v9 }
  0x49   :  { %956 = vmatpush3.bf16.msra.mxu1 %v1112_v27 }
  0x4a   :  { %957 = vmatprep.subr.bf16.mxu1 %v1113_v28 }
  0x4b   :  { %621 = vmatpush1.bf16.msra.mxu0 %v1077_v11 }
  0x4c   :  { %622 = vmatprep.subr.bf16.mxu0 %v1085_v12 }
  0x4d   :  { %958 = vmatpush3.bf16.msra.mxu1 %v1114_v29 }
  0x4e   :  { %959 = vmatprep.subr.bf16.mxu1 %v1115_v30 }
  0x4f   :  { %623 = vmatpush1.bf16.msra.mxu0 %v1083_v14 }
  0x50   :  { %624 = vmatprep.subr.bf16.mxu0 %v1091_v15 }
  0x51   :  { %960 = vmatpush3.bf16.msra.mxu1 %v1116_v31 }
  0x52   :  { %961 = vmatprep.subr.bf16.mxu1 %v1117_v32 }
  0x53   :  { %625 = vmatpush1.bf16.msra.mxu0 %v1089_v16 }
  0x54   :  { %626 = vmatprep.subr.bf16.mxu0 %v1097_v17 }
  0x55   :  { %962 = vmatpush3.bf16.msra.mxu1 %v1118_v33 }
  0x56   :  { %963 = vmatprep.subr.bf16.mxu1 %v1119_v34 }
  0x57   :  { %627 = vmatpush1.bf16.msra.mxu0 %v1095_v18 }
  0x58   :  { %628 = vmatprep.subr.bf16.mxu0 %v1103_v19 }
  0x59   :  { %964 = vmatpush3.bf16.msra.mxu1 %v1120_v35 }
  0x5a   :  { %965 = vmatprep.subr.bf16.mxu1 %v1121_v36 }
  0x5b   :  { %629 = vmatpush1.bf16.msra.mxu0 %v1101_v20 }
  0x5c   :  { %630 = vmatprep.subr.bf16.mxu0 %v1108_v21 }
  0x5d   :  { %966 = vmatpush3.bf16.msra.mxu1 %v1122_v37 }
  0x5e   :  { %967 = vmatprep.subr.bf16.mxu1 %v1123_v38 }
  0x5f   :  { %631 = vmatpush1.bf16.msra.mxu0 %v1106_v22 }
  0x61   :  { %968 = vmatpush3.bf16.msra.mxu1 %v1124_v39 }
  0x62   :  { %649 = vmatmul.mubr.bf16.vlgmr.msra.gmra.mrb[0].mxu0 %v1064_v23 }
 0x117   :  { %v568_v40 = vpop.f32.mrb[0].mxu1 }
 0x118   :  { %v570_v41 = vpop.f32.mrb[1].mxu1  ;;  %v569_v51 = vadd.f32 %v568_v40, %v109_v49 }
 0x119   :  { %v572_v42 = vpop.f32.mrb[2].mxu1  ;;  %v571_v52 = vadd.f32 %v570_v41, %v113_v50 }
 0x11a   :  { %v573_v44 = vpop.f32.mrb[3].mxu1 }
 0x135   :  { %v650_v53 = vpop.f32.mrb[0].mxu0 }
 0x136   :  { %v976_v54 = vadd.f32 %v650_v53, %v569_v51  ;;  %v652_v55 = vpop.f32.mrb[1].mxu0 }
 0x137   :  { %v978_v56 = vadd.f32 %v652_v55, %v571_v52  ;;  %v654_v57 = vpop.f32.mrb[2].mxu0 }
 0x138   :  { %v657_v58 = vsub.f32 0.0, %v976_v54  ;;  %v655_v59 = vpop.f32.mrb[3].mxu0 }
 0x139   :  { %v658_v60 = vsub.f32 0.0, %v978_v56 }
 0x13a   :  { %v659_v61 = vmul.f32 1.442695, %v657_v58 }
 0x13b   :  { %v661_v62 = vmul.f32 1.442695, %v658_v60 }
 0x13c   :  { %1125 = vpow2.f32 %v659_v61 }
 0x13d   :  { %1127 = vpow2.f32 %v661_v62 }
 0x146   :  { %v1126_v63 = vpop.eup %1125 }
 0x147   :  { %v1128_v0 = vpop.eup %1127  ;;  %v663_v1 = vadd.f32 1.0, %v1126_v63 }
 0x148   :  { %v664_v2 = vadd.f32 1.0, %v1128_v0 }
 0x149   :  { %1129 = vrcp.f32 %v663_v1 }
 0x14a   :  { %1131 = vrcp.f32 %v664_v2 }
 0x153   :  { %v1130_v3 = vpop.eup %1129 }
 0x154   :  { %v1132_v4 = vpop.eup %1131  ;;  %v669_v6 = vpack.c.bf16 %v1130_v3, %v1130_v3 }
 0x155   :  { %v670_v5 = vpack.c.bf16 %v1132_v4, %v1132_v4 }
 0x157   :  { %838 = vmatprep.mubr.bf16.mxu1 %v670_v5 }
 0x158   :  { %839 = vmatmul.mubr.bf16.vlgmr.msra.gmra.mrb[4].mxu1 %v669_v6 }
 0x22b   :  { %v969_v7 = vpop.f32.mrb[4].mxu1 }
 0x22c   :  { %v970_v9 = vpop.f32.mrb[5].mxu1 }
 0x22d   :  { %v971_v10 = vadd.f32 %v970_v9, %v969_v7  ;;  %v972_v11 = vpop.f32.mrb[6].mxu1 }
 0x22e   :  { %v973_v12 = vpop.f32.mrb[7].mxu1 }
 0x22f   :  { %v841_v13 = vadd.f32 %v971_v10, %v936_v8 }
 0x231   :  { %846 = vst [vmem:[%s1481_s5] sm:$0xff] %v841_v13 }

</bundles_post_ra>
